<compile_context>
chip_gen: v7x
topology: tpu7x:2x2x1
jax: 0.10.0
libtpu: 0.0.40
codegen_flags: <defaults>
</compile_context>

<pallas_src>
import jax
import jax.numpy as jnp
from jax import lax
from jax.experimental import pallas as pl
from jax.experimental.pallas import tpu as pltpu


def _distmult_kernel(e1_ref, rel_ref, e2t_ref, out_ref):
    # e1/rel: (TB, M, D); e2t: (TB, D, TN); out: (TB, M, TN)
    h = e1_ref[...] * rel_ref[...]                       # DistMult fusion (VPU)
    # Batched (M, D) x (D, TN) matmul on the MXU; RHS already in (K, N) layout.
    scores = lax.dot_general(
        h,
        e2t_ref[...],
        dimension_numbers=(((2,), (1,)), ((0,), (0,))),
        preferred_element_type=jnp.float32,
    )
    out_ref[...] = scores.astype(out_ref.dtype)


def _round_up(x, m):
    return ((x + m - 1) // m) * m


def _largest_divisor_leq(total, cap):
    """Largest divisor of `total` that is <= cap (>= 1)."""
    cap = max(1, min(cap, total))
    for t in range(cap, 0, -1):
        if total % t == 0:
            return t
    return 1


def _largest_tile(total, cap, quantum):
    """Largest divisor of `total` that is a multiple of `quantum` and <= cap.

    Falls back to the full dim when no such divisor exists (e.g. `total` is
    smaller than `quantum` or not a multiple of it).
    """
    if total <= cap:
        return total
    t = (cap // quantum) * quantum
    while t >= quantum:
        if total % t == 0:
            return t
        t -= quantum
    return total


def _padded_block_bytes(shape, itemsize):
    """VMEM bytes of one block under Mosaic (sublane, lane) tiling."""
    *lead, s, l = shape
    lead_elems = 1
    for d in lead:
        lead_elems *= d
    sublane_q = 8 * max(1, 4 // itemsize)        # f32: 8, bf16: 16, int8: 32
    return lead_elems * _round_up(s, sublane_q) * _round_up(l, 128) * itemsize


def _double_buffered_bytes(tb, m, d, tn, in_itemsize, out_itemsize):
    per_step = (
        2 * _padded_block_bytes((tb, m, d), in_itemsize)     # e1, rel
        + _padded_block_bytes((tb, d, tn), in_itemsize)      # e2 in (B, D, N)
        + _padded_block_bytes((tb, m, tn), out_itemsize)     # logits
    )
    return 2 * per_step   # Pallas double-buffers every operand by default


def _vmem_capacity_bytes():
    try:
        cap = int(getattr(pltpu.get_tpu_info(), "vmem_capacity_bytes", 0))
        if cap > 0:
            return cap
    except Exception:
        pass
    return 64 * 1024 * 1024   # conservative: v7x physical per-TensorCore VMEM


def distmult_forward(e1, rel, e2, *, e2_is_transposed=False, out_dtype=None,
                     tn_cap=8192, tb_cap=8, e2_buffer_count=2):
    """DistMult scores.

    e1, rel: (B, M, D); e2: (B, N, D) (or (B, D, N) if e2_is_transposed=True,
    which avoids the one-time wrapper transpose). Returns logits (B, M, N).
    """
    B, M, D = e1.shape
    e2t = e2 if e2_is_transposed else jnp.swapaxes(e2, 1, 2)    # (B, D, N)
    N = e2t.shape[2]

    if out_dtype is None:
        out_dtype = jnp.result_type(e1.dtype, rel.dtype, e2.dtype)
    in_itemsize = jnp.dtype(e1.dtype).itemsize
    out_itemsize = jnp.dtype(out_dtype).itemsize

    # Pad the candidate axis so it can be tiled into lane-dense 128-multiples
    # (padding columns produce garbage scores that are sliced off below).
    if N > 128 and N % 128 != 0:
        n_padded = _round_up(N, 128)
        e2t = jnp.pad(e2t, ((0, 0), (0, 0), (0, n_padded - N)))
    else:
        n_padded = N

    # Per-generation VMEM budget + explicit compiler limit.
    vmem_cap = _vmem_capacity_bytes()
    vmem_budget = min(int(0.6 * vmem_cap), 96 * 1024 * 1024)
    vmem_limit = int(min(vmem_cap, vmem_budget + 16 * 1024 * 1024))

    # Candidate-axis tile: 128-multiple when possible (lane-dense stores).
    tn = _largest_tile(n_padded, max(tn_cap, 128), 128)
    # Batch tile: largest divisor of B (no gcd degeneracy for odd B).
    tb = _largest_divisor_leq(B, tb_cap)

    # Shrink tiles until the padded, double-buffered working set fits.
    while _double_buffered_bytes(tb, M, D, tn, in_itemsize, out_itemsize) > vmem_budget:
        if tn % 256 == 0:
            tn //= 2                       # stays a 128-multiple divisor
        elif tb > 1:
            tb = _largest_divisor_leq(B, tb - 1)
        else:
            break                          # smallest expressible tiling

    n_b_steps = B // tb
    n_n_steps = n_padded // tn

    e2_kwargs = {}
    if e2_buffer_count != 2:
        # Deeper e2 pipelining (e.g. 3 on v5e) if DMA is still exposed.
        e2_kwargs["pipeline_mode"] = pl.Buffered(e2_buffer_count)

    # Put the grid axis with more steps first so the v7x megacore's sharded
    # parallel axis has >= 2 steps per core (no-op on single-TC chips).
    if n_n_steps >= n_b_steps:
        grid = (n_n_steps, n_b_steps)
        e1_spec = pl.BlockSpec((tb, M, D), lambda j, b: (b, 0, 0))
        rel_spec = pl.BlockSpec((tb, M, D), lambda j, b: (b, 0, 0))
        e2_spec = pl.BlockSpec((tb, D, tn), lambda j, b: (b, 0, j), **e2_kwargs)
        out_spec = pl.BlockSpec((tb, M, tn), lambda j, b: (b, 0, j))
    else:
        grid = (n_b_steps, n_n_steps)
        e1_spec = pl.BlockSpec((tb, M, D), lambda b, j: (b, 0, 0))
        rel_spec = pl.BlockSpec((tb, M, D), lambda b, j: (b, 0, 0))
        e2_spec = pl.BlockSpec((tb, D, tn), lambda b, j: (b, 0, j), **e2_kwargs)
        out_spec = pl.BlockSpec((tb, M, tn), lambda b, j: (b, 0, j))

    cost = pl.CostEstimate(
        flops=2 * B * M * N * D + B * M * D,
        transcendentals=0,
        bytes_accessed=(2 * B * M * D + B * N * D) * in_itemsize
                       + B * M * N * out_itemsize,
    )

    out = pl.pallas_call(
        _distmult_kernel,
        out_shape=jax.ShapeDtypeStruct((B, M, n_padded), out_dtype),
        grid_spec=pl.GridSpec(
            grid=grid,
            in_specs=[e1_spec, rel_spec, e2_spec],
            out_specs=out_spec,
        ),
        compiler_params=pltpu.CompilerParams(
            dimension_semantics=("parallel", "parallel"),
            vmem_limit_bytes=vmem_limit,
        ),
        cost_estimate=cost,
    )(e1, rel, e2t)

    if n_padded != N:
        out = out[:, :, :N]
    return out


def distmult_reference(e1, rel, e2):
    # Pure-JAX reference of the PyTorch forward (eval mode: dropout = identity).
    return jnp.einsum("bmd,bnd->bmn", e1 * rel, e2)


if __name__ == "__main__":
    # args = {'embedding_dim': 32, 'input_drop': 0.2}  (dropout inactive at eval)
    # TODO(synk): training-mode dropout (pltpu.prng_random_bits mask) not implemented;
    #             eval-mode semantics (identity) are reproduced exactly.
    B, M, N, D = 2, 8, 16, 32  # batch, queries per batch, candidate entities, embedding_dim

    key = jax.random.PRNGKey(0)
    k1, k2, k3 = jax.random.split(key, 3)
    e1 = jax.random.normal(k1, (B, M, D), dtype=jnp.float32)
    rel = jax.random.normal(k2, (B, M, D), dtype=jnp.float32)
    e2 = jax.random.normal(k3, (B, N, D), dtype=jnp.float32)

    logits = distmult_forward(e1, rel, e2)
    jax.block_until_ready(logits)

    ref = distmult_reference(e1, rel, e2)
    assert logits.shape == (B, M, N)
    assert jnp.allclose(logits, ref, atol=1e-4, rtol=1e-4)

    print("KERNEL_OK")
</pallas_src>

<mosaic_0001>
module attributes {stable_mosaic.version = 11 : i64} {
  func.func @_distmult_kernel(%arg0: i32, %arg1: i32, %arg2: memref<2x8x32xf32, #tpu.memory_space<vmem>>, %arg3: memref<2x8x32xf32, #tpu.memory_space<vmem>>, %arg4: memref<2x32x16xf32, #tpu.memory_space<vmem>>, %arg5: memref<2x8x16xf32, #tpu.memory_space<vmem>>) attributes {dimension_semantics = [#tpu.dimension_semantics<parallel>, #tpu.dimension_semantics<parallel>], iteration_bounds = array<i64: 1, 1>, scalar_prefetch = 0 : i64, scratch_operands = 0 : i64, tpu.core_type = #tpu.core_type<tc>, window_params = [{transform_indices = @transform_0, window_bounds = array<i64: 2, 8, 32>}, {transform_indices = @transform_1, window_bounds = array<i64: 2, 8, 32>}, {transform_indices = @transform_2, window_bounds = array<i64: 2, 32, 16>}, {transform_indices = @transform_3, window_bounds = array<i64: 2, 8, 16>}]} {
    %c0 = arith.constant 0 : index
    %c0_0 = arith.constant 0 : index
    %c0_1 = arith.constant 0 : index
    %0 = vector.load %arg2[%c0, %c0_0, %c0_1] : memref<2x8x32xf32, #tpu.memory_space<vmem>>, vector<2x8x32xf32>
    %c0_2 = arith.constant 0 : index
    %c0_3 = arith.constant 0 : index
    %c0_4 = arith.constant 0 : index
    %1 = vector.load %arg3[%c0_2, %c0_3, %c0_4] : memref<2x8x32xf32, #tpu.memory_space<vmem>>, vector<2x8x32xf32>
    %2 = arith.mulf %0, %1 : vector<2x8x32xf32>
    %c0_5 = arith.constant 0 : index
    %c0_6 = arith.constant 0 : index
    %c0_7 = arith.constant 0 : index
    %3 = vector.load %arg4[%c0_5, %c0_6, %c0_7] : memref<2x32x16xf32, #tpu.memory_space<vmem>>, vector<2x32x16xf32>
    %cst = arith.constant dense<0.000000e+00> : vector<2x8x16xf32>
    %4 = tpu.matmul %2, %3, %cst {dimension_numbers = #tpu.dot_dimension_numbers<[2], [1], [1], [2], [0, 0, 0, 1, 1, 2], [0], [0]>} : vector<2x8x32xf32>, vector<2x32x16xf32>, vector<2x8x16xf32> -> vector<2x8x16xf32>
    %c0_8 = arith.constant 0 : index
    %c0_9 = arith.constant 0 : index
    %c0_10 = arith.constant 0 : index
    %5 = vector.load %arg5[%c0_8, %c0_9, %c0_10] : memref<2x8x16xf32, #tpu.memory_space<vmem>>, vector<2x8x16xf32>
    tpu.vector_store %arg5[%c0_8, %c0_9, %c0_10], %4 {strides = array<i32>} : memref<2x8x16xf32, #tpu.memory_space<vmem>>, vector<2x8x16xf32>,
    return
  }
  func.func @transform_0(%arg0: i32, %arg1: i32) -> (i32, i32, i32) {
    %c0_i32 = arith.constant 0 : i32
    %c0_i32_0 = arith.constant 0 : i32
    %c0_i32_1 = arith.constant 0 : i32
    return %arg1, %c0_i32, %c0_i32_0 : i32, i32, i32
  }
  func.func @transform_1(%arg0: i32, %arg1: i32) -> (i32, i32, i32) {
    %c0_i32 = arith.constant 0 : i32
    %c0_i32_0 = arith.constant 0 : i32
    %c0_i32_1 = arith.constant 0 : i32
    return %arg1, %c0_i32, %c0_i32_0 : i32, i32, i32
  }
  func.func @transform_2(%arg0: i32, %arg1: i32) -> (i32, i32, i32) {
    %c0_i32 = arith.constant 0 : i32
    %c0_i32_0 = arith.constant 0 : i32
    return %arg1, %c0_i32, %arg0 : i32, i32, i32
  }
  func.func @transform_3(%arg0: i32, %arg1: i32) -> (i32, i32, i32) {
    %c0_i32 = arith.constant 0 : i32
    %c0_i32_0 = arith.constant 0 : i32
    return %arg1, %c0_i32, %arg0 : i32, i32, i32
  }
}

</mosaic_0001>

<bundles_post_ra>
// kernel: tpu_custom_call.1
= control target key start
LH: loop header
LB: loop body
LE: loop exit
PB: predicated region body
PF: predicated region fallthrough
CT: control target
= control target key end

     0   :  { %v271_v3 = vmov 0.0|0.0   ;;  %vm272_vm0 = vmmov 0   ;;  %v273_v11 = vmov 0.0   ;;  %s345_s0 = inlined_call_operand.vmem [shape: f32[2,8,32], index: 0, kind: input, shape index: {}]   ;;  %s346_s1 = inlined_call_operand.vmem [shape: f32[2,8,32], index: 1, kind: input, shape index: {}]   ;;  %s347_s2 = inlined_call_operand.vmem [shape: f32[2,32,16], index: 2, kind: input, shape index: {}]   ;;  %s348_s3 = inlined_call_operand.hbm [shape: f32[2,8,16], index: 3, kind: output, shape index: {}]  }
   0x1   :  { %v21_v0 = vld [vmem:[%s347_s2] sm:$0xff]  ;;  %v22_v1 = vld [vmem:[%s347_s2 + $0x8] sm:$0xff]  ;;  %229 = vmatprep.subr.bf16.mxu0 %v271_v3  ;;  %235 = vmatprep.subr.bf16.mxu1 %v271_v3  ;;  %v23_v6 = vld [vmem:[%s347_s2 + $0x10] sm:$0xff] }
   0x2   :  { %v25_v2 = vld [vmem:[%s347_s2 + $0x20] sm:$0xff]  ;;  %v230_v4 = vpack.c.bf16 %v22_v1, %v21_v0  ;;  %v26_v5 = vld [vmem:[%s347_s2 + $0x28] sm:$0xff]  ;;  %v24_v7 = vld [vmem:[%s347_s2 + $0x18] sm:$0xff]  ;;  %215 = vmatprep.mubr.msk.f32.mxu0 %vm272_vm0, %v273_v11  ;;  %226 = vmatprep.mubr.msk.f32.mxu1 %vm272_vm0, %v273_v11 }
   0x3   :  { %v236_v8 = vpack.c.bf16 %v26_v5, %v25_v2  ;;  %v27_v9 = vld [vmem:[%s347_s2 + $0x30] sm:$0xff]  ;;  %v28_v10 = vld [vmem:[%s347_s2 + $0x38] sm:$0xff]  ;;  %v233_v12 = vpack.c.bf16 %v24_v7, %v23_v6  ;;  %v15_v13 = vld [vmem:[%s345_s0] sm:$0xff] }
   0x4   :  { %231 = vmatpush3.bf16.msra.mxu0 %v230_v4  ;;  %v17_v14 = vld [vmem:[%s346_s1] sm:$0xff]  ;;  %v239_v15 = vpack.c.bf16 %v28_v10, %v27_v9  ;;  %v16_v16 = vld [vmem:[%s345_s0 + $0x8] sm:$0xff] }
   0x5   :  { %237 = vmatpush3.bf16.msra.mxu1 %v236_v8  ;;  %232 = vmatprep.subr.bf16.mxu0 %v271_v3  ;;  %v18_v17 = vld [vmem:[%s346_s1 + $0x8] sm:$0xff] }
   0x6   :  { %8 = vsyncpa [#allocation3], 0  ;;  %238 = vmatprep.subr.bf16.mxu1 %v271_v3  ;;  %v19_v18 = vmul.f32 %v17_v14, %v15_v13  ;;  %vm29_vm1 = vcmask 261120   ;;  %v20_v19 = vmul.f32 %v18_v17, %v16_v16  ;;  %s274_s8 = smov [#allocation2]   ;;  %vm176_vm2 = vcmask 130048  }
   0x7   :  { %s184_s9 = sshll.u32 %s274_s8, 4  ;;  %s185_s9 = int_to_ptr.vmem [resolvable:$true] %s184_s9 }
   0x8   :  { %234 = vmatpush3.bf16.msra.mxu0 %v233_v12  ;;  %s247_s0 = scalar_lea.vmem %s185_s9, 256  ;;  %p252_p1 = scmp.lt.s32.totalorder %s185_s9, %s185_s9 }
   0x9   :  { %240 = vmatpush3.bf16.msra.mxu1 %v239_v15  ;;  %p248_p0 = scmp.ne.s32.totalorder %s185_s9, %s247_s0  ;;  %p253_p2 = scmp.lt.s32.totalorder %s247_s0, %s247_s0 }
   0xb   :  { %216 = vmatmul.mubr.msk.f32.vlgmr.msra.gmra.mrb[0].mxu0 %vm29_vm1, %v19_v18  ;;  %p254_p3 = por %p253_p2, %p252_p1 }
   0xc   :  { %227 = vmatmul.mubr.msk.f32.vlgmr.msra.gmra.mrb[0].mxu1 %vm29_vm1, %v20_v19 }
   0xd   :  { %p255_p4 = pnand %p254_p3, %p248_p0 }
  0xde   :  { %v99_v20 = vpop.f32.mrb[0].mxu0 }
  0xdf   :  { %177 = vst.msk [vmem:[#allocation2] sm:$0xff] %vm176_vm2, %v99_v20  ;;  %v172_v21 = vpop.f32.mrb[0].mxu1  ;;  %v217_v22 = vpop.f32.mrb[1].mxu0 }
  0xe0   :  { %178 = vst.msk [vmem:[#allocation2 + $0x8] sm:$0xff] %vm176_vm2, %v172_v21  ;;  %v228_v23 = vpop.f32.mrb[1].mxu1 }
  0xe1   :  { %258 = shalt.err (!%p255_p4)
}
  0xe2   :  { %s259_s11 = scalar_lea.hbm %s348_s3, 256 }
  0xe3   :  { %p260_p5 = scmp.ne.s32.totalorder %s348_s3, %s259_s11  ;;  %p263_p6 = scmp.lt.u32.totalorder %s259_s11, %s348_s3 }
  0xe5   :  { %p265_p7 = pnand %p263_p6, %p260_p5 }
  0xe7   :  { %268 = shalt.err (!%p265_p7)
}
  0xe8   :  { %s275_s16 = smov 128   ;;  %s276_s17 = smov 8  }
  0xe9   :  { %190 = dma.vmem_to_hbm [thread:$0]  %s185_s9, 256, %s348_s3, [#allocation3], %s275_s16, %s275_s16, %s276_s17  }
  0xea   :  { %269 = dma.done.wait [#allocation3], 256  }
  0xeb   :  { %270 = vsyncadd [#allocation3], 4294967040 }
  0xec   :  { %194 = vsyncpa [#allocation3], 1 }

</bundles_post_ra>
